<compile_context>
chip_gen: v6e
topology: v6e:2x2x1
jax: 0.10.0
libtpu: 0.0.40
codegen_flags: <defaults>
</compile_context>

<pallas_src>
import math

import jax
import jax.numpy as jnp
from jax.experimental import pallas as pl
from jax.experimental.pallas import tpu as pltpu

_LANES = 128
_SUBLANES = 8


def _bce_partial_kernel(x_ref, t_ref, o_ref):
    # Blocks are (K, 8, 128); upconvert in vregs (HBM traffic stays at input dtype).
    x = x_ref[...].astype(jnp.float32)
    t = t_ref[...].astype(jnp.float32)

    # nn.BCELoss clamps both log terms at -100.  Zero-padded tail elements
    # contribute exactly 0: t=0 kills the clamped log(0) term and log(1-0)=0.
    # TODO(synk): switch to jnp.log1p(-x) once its Mosaic lowering is guaranteed.
    log_x = jnp.maximum(jnp.log(x), -100.0)
    log_1mx = jnp.maximum(jnp.log(1.0 - x), -100.0)
    bce = -(t * log_x + (1.0 - t) * log_1mx)

    # Fold the leading (non-tiled) axis with pure VPU vreg adds -> one (8,128)
    # lane-dense partial per grid step.  Cross-lane/sublane reduce + 1/n scale
    # happen once, outside the kernel.
    o_ref[...] = bce.sum(axis=0)


def bce_loss_pallas(input_scale, target_scale, tile_rows=512):
    """input_scale, target_scale: same shape (B, ...), predictions in (0, 1)."""
    assert input_scale.shape == target_scale.shape
    assert tile_rows % _SUBLANES == 0
    B = input_scale.shape[0]
    n = math.prod(input_scale.shape[1:])  # per-sample element count
    total = B * n

    # Flatten everything and zero-pad up to a whole number of (tile_rows, 128)
    # tiles.  Zero pads contribute 0 to the BCE sum (see kernel comment).
    rows = pl.cdiv(total, _LANES)
    tr = min(tile_rows, pl.cdiv(rows, _SUBLANES) * _SUBLANES)
    padded_rows = pl.cdiv(rows, tr) * tr
    pad = padded_rows * _LANES - total

    x = jnp.pad(input_scale.reshape(-1), (0, pad))
    t = jnp.pad(target_scale.reshape(-1), (0, pad))
    # Present as (row_groups, 8, 128) so the kernel's fold is a leading-axis
    # vreg add (no in-kernel reshape needed).
    x = x.reshape(padded_rows // _SUBLANES, _SUBLANES, _LANES)
    t = t.reshape(padded_rows // _SUBLANES, _SUBLANES, _LANES)

    grid = padded_rows // tr
    blk = tr // _SUBLANES  # leading-dim blocks per grid step

    partials = pl.pallas_call(
        _bce_partial_kernel,
        out_shape=jax.ShapeDtypeStruct((grid * _SUBLANES, _LANES), jnp.float32),
        grid=(grid,),
        in_specs=[
            pl.BlockSpec((blk, _SUBLANES, _LANES), lambda i: (i, 0, 0)),
            pl.BlockSpec((blk, _SUBLANES, _LANES), lambda i: (i, 0, 0)),
        ],
        out_specs=pl.BlockSpec((_SUBLANES, _LANES), lambda i: (i, 0)),
        compiler_params=pltpu.CompilerParams(
            dimension_semantics=("parallel",),
        ),
    )(x, t)

    # sum_b mean_b == sum(all elements) / n  (valid because all samples share n)
    return jnp.sum(partials) / n


def _bce_loss_ref(x, t):
    x = x.astype(jnp.float32)
    t = t.astype(jnp.float32)
    log_x = jnp.maximum(jnp.log(x), -100.0)
    log_1mx = jnp.maximum(jnp.log(1.0 - x), -100.0)
    bce = -(t * log_x + (1.0 - t) * log_1mx)
    per_sample = jnp.mean(bce.reshape(x.shape[0], -1), axis=1)
    return jnp.sum(per_sample)


if __name__ == "__main__":
    key = jax.random.PRNGKey(0)
    k1, k2 = jax.random.split(key)

    B, C, H, W = 2, 4, 16, 16
    # predictions must lie in (0, 1) for BCE -> sigmoid of a normal draw
    inputs = jax.nn.sigmoid(jax.random.normal(k1, (B, C, H, W), dtype=jnp.float32))
    targets = jax.random.uniform(k2, (B, C, H, W), dtype=jnp.float32)

    loss = bce_loss_pallas(inputs, targets)
    jax.block_until_ready(loss)

    ref = _bce_loss_ref(inputs, targets)
    assert jnp.allclose(loss, ref, rtol=1e-5, atol=1e-5), (loss, ref)

    # bf16 inputs stay bf16 in HBM (no wrapper upcast); math is still f32 in-kernel.
    loss_bf16 = bce_loss_pallas(
        inputs.astype(jnp.bfloat16), targets.astype(jnp.bfloat16)
    )
    jax.block_until_ready(loss_bf16)
    ref_bf16 = _bce_loss_ref(inputs.astype(jnp.bfloat16), targets.astype(jnp.bfloat16))
    assert jnp.allclose(loss_bf16, ref_bf16, rtol=1e-3, atol=1e-3), (loss_bf16, ref_bf16)

    print("KERNEL_OK")
</pallas_src>

<mosaic_0001>
module attributes {stable_mosaic.version = 11 : i64} {
  func.func @_bce_partial_kernel(%arg0: i32, %arg1: memref<2x8x128xf32, #tpu.memory_space<vmem>>, %arg2: memref<2x8x128xf32, #tpu.memory_space<vmem>>, %arg3: memref<8x128xf32, #tpu.memory_space<vmem>>) attributes {dimension_semantics = [#tpu.dimension_semantics<parallel>], iteration_bounds = array<i64: 1>, scalar_prefetch = 0 : i64, scratch_operands = 0 : i64, tpu.core_type = #tpu.core_type<tc>, window_params = [{transform_indices = @transform_0, window_bounds = array<i64: 2, 8, 128>}, {transform_indices = @transform_1, window_bounds = array<i64: 2, 8, 128>}, {transform_indices = @transform_2, window_bounds = array<i64: 8, 128>}]} {
    %c0 = arith.constant 0 : index
    %c0_0 = arith.constant 0 : index
    %c0_1 = arith.constant 0 : index
    %0 = vector.load %arg1[%c0, %c0_0, %c0_1] : memref<2x8x128xf32, #tpu.memory_space<vmem>>, vector<2x8x128xf32>
    %c0_2 = arith.constant 0 : index
    %c0_3 = arith.constant 0 : index
    %c0_4 = arith.constant 0 : index
    %1 = vector.load %arg2[%c0_2, %c0_3, %c0_4] : memref<2x8x128xf32, #tpu.memory_space<vmem>>, vector<2x8x128xf32>
    %2 = math.log %0 : vector<2x8x128xf32>
    %cst = arith.constant -1.000000e+02 : f32
    %3 = vector.broadcast %cst : f32 to vector<2x8x128xf32>
    %4 = arith.maximumf %2, %3 : vector<2x8x128xf32>
    %cst_5 = arith.constant 1.000000e+00 : f32
    %5 = vector.broadcast %cst_5 : f32 to vector<2x8x128xf32>
    %6 = arith.subf %5, %0 : vector<2x8x128xf32>
    %7 = math.log %6 : vector<2x8x128xf32>
    %cst_6 = arith.constant -1.000000e+02 : f32
    %8 = vector.broadcast %cst_6 : f32 to vector<2x8x128xf32>
    %9 = arith.maximumf %7, %8 : vector<2x8x128xf32>
    %10 = arith.mulf %1, %4 : vector<2x8x128xf32>
    %cst_7 = arith.constant 1.000000e+00 : f32
    %11 = vector.broadcast %cst_7 : f32 to vector<2x8x128xf32>
    %12 = arith.subf %11, %1 : vector<2x8x128xf32>
    %13 = arith.mulf %12, %9 : vector<2x8x128xf32>
    %14 = arith.addf %10, %13 : vector<2x8x128xf32>
    %cst_8 = arith.constant 0.000000e+00 : f32
    %15 = vector.broadcast %cst_8 : f32 to vector<2x8x128xf32>
    %16 = arith.subf %15, %14 : vector<2x8x128xf32>
    %cst_9 = arith.constant dense<0.000000e+00> : vector<8x128xf32>
    %17 = vector.multi_reduction <add>, %16, %cst_9 [0] : vector<2x8x128xf32> to vector<8x128xf32>
    %c0_10 = arith.constant 0 : index
    %c0_11 = arith.constant 0 : index
    %18 = vector.load %arg3[%c0_10, %c0_11] : memref<8x128xf32, #tpu.memory_space<vmem>>, vector<8x128xf32>
    tpu.vector_store %arg3[%c0_10, %c0_11], %17 {strides = array<i32>} : memref<8x128xf32, #tpu.memory_space<vmem>>, vector<8x128xf32>,
    return
  }
  func.func @transform_0(%arg0: i32) -> (i32, i32, i32) {
    %c0_i32 = arith.constant 0 : i32
    %c0_i32_0 = arith.constant 0 : i32
    %c0_i32_1 = arith.constant 0 : i32
    return %arg0, %c0_i32, %c0_i32_0 : i32, i32, i32
  }
  func.func @transform_1(%arg0: i32) -> (i32, i32, i32) {
    %c0_i32 = arith.constant 0 : i32
    %c0_i32_0 = arith.constant 0 : i32
    %c0_i32_1 = arith.constant 0 : i32
    return %arg0, %c0_i32, %c0_i32_0 : i32, i32, i32
  }
  func.func @transform_2(%arg0: i32) -> (i32, i32) {
    %c0_i32 = arith.constant 0 : i32
    %c0_i32_0 = arith.constant 0 : i32
    return %arg0, %c0_i32 : i32, i32
  }
}

</mosaic_0001>

<bundles_post_ra>
// kernel: tpu_custom_call.1
= control target key start
LH: loop header
LB: loop body
LE: loop exit
PB: predicated region body
PF: predicated region fallthrough
CT: control target
= control target key end

     0   :  { %7 = vsyncpa [#allocation3], 0  ;;  %s194_s0 = inlined_call_operand.hbm [shape: f32[2,8,128], index: 0, kind: input, shape index: {}]   ;;  %s195_s1 = inlined_call_operand.hbm [shape: f32[2,8,128], index: 1, kind: input, shape index: {}]   ;;  %s196_s2 = inlined_call_operand.hbm [shape: f32[8,128], index: 2, kind: output, shape index: {}]  }
   0x1   :  { %8 = vsyncpa [#allocation6], 0 }
   0x2   :  { %9 = vsyncpa [#allocation4], 0  ;;  %s165_s9 = smov [#allocation2]  }
   0x3   :  { %s15_s10 = sshll.u32 %s165_s9, 4  ;;  %s16_s10 = int_to_ptr.vmem [resolvable:$true] %s15_s10 }
   0x4   :  { %s107_s11 = scalar_lea.vmem %s16_s10, 256  ;;  %p112_p1 = scmp.lt.s32.totalorder %s16_s10, %s16_s10 }
   0x5   :  { %p108_p0 = scmp.ne.s32.totalorder %s16_s10, %s107_s11  ;;  %p113_p2 = scmp.lt.s32.totalorder %s107_s11, %s107_s11 }
   0x7   :  { %p114_p3 = por %p113_p2, %p112_p1 }
   0x9   :  { %p115_p4 = pnand %p114_p3, %p108_p0 }
   0xb   :  { %118 = shalt.err (!%p115_p4)
}
   0xc   :  { %s166_s12 = smov 128   ;;  %s167_s13 = smov 8  }
   0xd   :  { %21 = dma.hbm_to_vmem [thread:$0]  %s194_s0, 256, %s16_s10, [#allocation3], %s166_s12, %s166_s12, %s167_s13  }
   0xe   :  { %s168_s16 = smov [#allocation5]  }
   0xf   :  { %s27_s17 = sshll.u32 %s168_s16, 4  ;;  %s28_s17 = int_to_ptr.vmem [resolvable:$true] %s27_s17 }
  0x10   :  { %s127_s18 = scalar_lea.vmem %s28_s17, 256  ;;  %p132_p6 = scmp.lt.s32.totalorder %s28_s17, %s28_s17 }
  0x11   :  { %p128_p5 = scmp.ne.s32.totalorder %s28_s17, %s127_s18  ;;  %p133_p7 = scmp.lt.s32.totalorder %s127_s18, %s127_s18 }
  0x13   :  { %p134_p8 = por %p133_p7, %p132_p6 }
  0x15   :  { %p135_p9 = pnand %p134_p8, %p128_p5 }
  0x17   :  { %138 = shalt.err (!%p135_p9)
}
  0x18   :  { %33 = dma.hbm_to_vmem [thread:$0]  %s195_s1, 256, %s28_s17, [#allocation6], %s166_s12, %s166_s12, %s167_s13  }
  0x19   :  { %159 = dma.done.wait [#allocation3], 256  }
  0x1a   :  { %160 = vsyncadd [#allocation3], 4294967040 }
  0x1b   :  { %161 = dma.done.wait [#allocation6], 256  }
  0x1c   :  { %162 = vsyncadd [#allocation6], 4294967040  ;;  %v40_v0 = vld [vmem:[#allocation2] sm:$0xff]  ;;  %v41_v1 = vld [vmem:[#allocation2 + $0x8] sm:$0xff]  ;;  %s169_s0 = smov [#allocation7]  }
  0x1d   :  { %91 = vlog2.f32 %v40_v0  ;;  %v50_v2 = vsub.f32 1.0, %v40_v0  ;;  %v51_v3 = vsub.f32 1.0, %v41_v1  ;;  %v42_v5 = vld [vmem:[#allocation5] sm:$0xff]  ;;  %v43_v7 = vld [vmem:[#allocation5 + $0x8] sm:$0xff]  ;;  %s76_s1 = sshll.u32 %s169_s0, 4  ;;  %s77_s1 = int_to_ptr.vmem [resolvable:$true] %s76_s1 }
  0x1e   :  { %93 = vlog2.f32 %v41_v1  ;;  %v60_v14 = vsub.f32 1.0, %v42_v5  ;;  %v61_v17 = vsub.f32 1.0, %v43_v7  ;;  %s139_s21 = scalar_lea.vmem %s77_s1, 128  ;;  %p144_p11 = scmp.lt.s32.totalorder %s77_s1, %s77_s1 }
  0x1f   :  { %95 = vlog2.f32 %v50_v2  ;;  %p140_p10 = scmp.ne.s32.totalorder %s77_s1, %s139_s21  ;;  %p145_p12 = scmp.lt.s32.totalorder %s139_s21, %s139_s21 }
  0x20   :  { %97 = vlog2.f32 %v51_v3 }
  0x21   :  { %p146_p13 = por %p145_p12, %p144_p11 }
  0x23   :  { %p147_p0 = pnand %p146_p13, %p140_p10 }
  0x2a   :  { %v92_v4 = vpop.eup %91 }
  0x2b   :  { %v94_v6 = vpop.eup %93  ;;  %v45_v8 = vmul.f32 0.6931472, %v92_v4 }
  0x2c   :  { %v96_v9 = vpop.eup %95  ;;  %v47_v10 = vmul.f32 0.6931472, %v94_v6 }
  0x2d   :  { %v98_v11 = vpop.eup %97  ;;  %v48_v12 = vmax.f32 %v45_v8, -100.0  ;;  %v53_v13 = vmul.f32 0.6931472, %v96_v9 }
  0x2e   :  { %v49_v15 = vmax.f32 %v47_v10, -100.0  ;;  %v55_v16 = vmul.f32 0.6931472, %v98_v11 }
  0x2f   :  { %v56_v18 = vmax.f32 %v53_v13, -100.0  ;;  %v58_v19 = vmul.f32 %v48_v12, %v42_v5 }
  0x30   :  { %v57_v20 = vmax.f32 %v55_v16, -100.0  ;;  %v59_v21 = vmul.f32 %v49_v15, %v43_v7 }
  0x31   :  { %v62_v22 = vmul.f32 %v60_v14, %v56_v18 }
  0x32   :  { %v63_v23 = vmul.f32 %v61_v17, %v57_v20 }
  0x33   :  { %v64_v24 = vadd.f32 %v62_v22, %v58_v19 }
  0x34   :  { %v65_v25 = vadd.f32 %v63_v23, %v59_v21 }
  0x35   :  { %v66_v26 = vsub.f32 0.0, %v64_v24 }
  0x36   :  { %v67_v27 = vsub.f32 0.0, %v65_v25 }
  0x38   :  { %v68_v28 = vadd.f32 %v67_v27, %v66_v26 }
  0x3a   :  { %69 = vst [vmem:[#allocation7] sm:$0xff] %v68_v28 }
  0x3b   :  { %150 = shalt.err (!%p147_p0)
}
  0x3c   :  { %79 = dma.vmem_to_hbm [thread:$0]  %s77_s1, 128, %s196_s2, [#allocation4]  }
  0x3d   :  { %163 = dma.done.wait [#allocation4], 128  }
  0x3e   :  { %164 = vsyncadd [#allocation4], 4294967168 }
  0x3f   :  { %83 = vsyncpa [#allocation3], 1 }
  0x40   :  { %84 = vsyncpa [#allocation6], 1 }
  0x41   :  { %85 = vsyncpa [#allocation4], 1 }

</bundles_post_ra>
